<compile_context>
chip_gen: v7x
topology: tpu7x:2x2x1
jax: 0.10.0
libtpu: 0.0.40
codegen_flags: <defaults>
</compile_context>

<pallas_src>
import functools
import math

import jax
import jax.numpy as jnp
import numpy as np
from jax.experimental import pallas as pl
from jax.experimental.pallas import tpu as pltpu

_MIB = 1024 * 1024
_LANE = 128
_MAX_COL_ELEMS = 512 * _LANE          # 65536 elems = 256 KiB per f32 row


# ----------------------------------------------------------------------------
# Gaussian kernel construction (== SpatialGaussianKernel.__init__)
# ----------------------------------------------------------------------------
def _gaussian_kernel_1d(kernel_size: int, sigma: float) -> np.ndarray:
    variance = float(sigma) ** 2
    coords = np.arange(kernel_size, dtype=np.float64)
    mean = (kernel_size - 1) / 2.0
    g = np.exp(-((coords - mean) ** 2) / (2.0 * variance))
    g = g / g.sum()
    return g.astype(np.float32)


def _gaussian_kernel_2d(kernel_size: int, sigma: float) -> np.ndarray:
    # Exactly as the PyTorch SpatialGaussianKernel builds it (used by the XLA
    # reference check).  The normalized 2D kernel is separable into the
    # normalized 1D kernel above: k2d[i, j] == k1d[i] * k1d[j].
    variance = float(sigma) ** 2
    coords = np.arange(kernel_size, dtype=np.float64)
    x_grid = np.tile(coords, (kernel_size, 1))
    y_grid = x_grid.T
    mean_xy = (kernel_size - 1) / 2.0
    k = (1.0 / (2.0 * math.pi * variance)) * np.exp(
        -((x_grid - mean_xy) ** 2 + (y_grid - mean_xy) ** 2) / (2.0 * variance)
    )
    k = k / k.sum()
    return k.astype(np.float32)


# ----------------------------------------------------------------------------
# Kernel 1 (runs once per forward): sigmoid + separable Gaussian blur of the
# suppression mask, fused into the batch-invariant coefficients used by the
# hot loop (so the per-sample kernel is pure mul/add).
# ----------------------------------------------------------------------------
def prep_kernel(alpha_pad_ref, mean_ref, std_ref, *out_refs,
                taps, K, H, W, with_capacity):
    # alpha_pad_ref : (C, H + 2p, W + 2p) reflection-padded alpha
    xp = jax.nn.sigmoid(alpha_pad_ref[...])

    # Separable blur: vertical (H) pass then horizontal (W) pass -> 2K taps.
    rows = taps[0] * xp[:, 0:H, :]
    for dy in range(1, K):
        rows = rows + taps[dy] * xp[:, dy:dy + H, :]
    lamb = taps[0] * rows[:, :, 0:W]
    for dx in range(1, K):
        lamb = lamb + taps[dx] * rows[:, :, dx:dx + W]

    mean = mean_ref[...]
    std = std_ref[...]
    one_minus = 1.0 - lamb
    noise_var = one_minus * one_minus                  # (1 - lamb)^2
    log_var = jnp.log(noise_var)                       # unclamped (matches torch cap)
    noise_std = jnp.exp(0.5 * jnp.clip(log_var, -10.0, 10.0))

    # Fused coefficients: z = r*a + b + c*eps ; mu = r*g - e ; cap = 0.5*mu^2 + d
    a_ref, b_ref, c_ref = out_refs[0], out_refs[1], out_refs[2]
    a_ref[...] = lamb
    b_ref[...] = mean * one_minus
    c_ref[...] = noise_std * std
    if with_capacity:
        g_ref, e_ref, d_ref = out_refs[3], out_refs[4], out_refs[5]
        g = lamb / std
        g_ref[...] = g
        e_ref[...] = mean * g
        d_ref[...] = -0.5 * (1.0 + log_var - noise_var)


# ----------------------------------------------------------------------------
# Kernel 2 (hot path): per-sample bottleneck on lane-dense (tb, tc) blocks of
# the (B, C*H*W) layout.  Shared coefficient blocks are (1, tc) and only
# re-fetched when the (outer) column-tile index changes.
# ----------------------------------------------------------------------------
def bottleneck_kernel(r_ref, eps_ref, *refs, relu, with_capacity):
    r = r_ref[...].astype(jnp.float32)
    eps = eps_ref[...].astype(jnp.float32)
    if with_capacity:
        a_ref, b_ref, c_ref, g_ref, e_ref, d_ref, z_ref, cap_ref = refs
    else:
        a_ref, b_ref, c_ref, z_ref = refs

    z = r * a_ref[...] + b_ref[...] + c_ref[...] * eps
    if relu:
        z = jnp.maximum(z, 0.0)
    z_ref[...] = z.astype(z_ref.dtype)

    if with_capacity:
        mu = r * g_ref[...] - e_ref[...]
        cap_ref[...] = (0.5 * (mu * mu) + d_ref[...]).astype(cap_ref.dtype)


# ----------------------------------------------------------------------------
# VMEM budgeting & tiling
# ----------------------------------------------------------------------------
_VMEM_CACHE = None


def _vmem_budget():
    """(vmem_limit_bytes, data_budget_bytes), generation-aware with headroom."""
    global _VMEM_CACHE
    if _VMEM_CACHE is None:
        try:
            cap = int(pltpu.get_tpu_info().vmem_capacity_bytes)
        except Exception:               # non-TPU backend / interpret mode
            cap = 64 * _MIB             # v7x-safe conservative default
        limit = min(max(cap - 16 * _MIB, 32 * _MIB), 64 * _MIB)
        data = max(limit - 12 * _MIB, 16 * _MIB)
        _VMEM_CACHE = (limit, data)
    return _VMEM_CACHE


def _choose_tiles(batch, chw, n_block_streams, n_shared, data_budget, sublane):
    """Pick (batch_tile, col_tile) for the (B, CHW) hot loop."""
    # Column (lane) tile: full CHW when small (full-dim blocks are always
    # legal), else a 128-multiple cap so per-row bytes stay bounded (<=256 KiB)
    # and the sublane floor below can never blow past the VMEM budget.
    tc = chw if chw <= _MAX_COL_ELEMS else _MAX_COL_ELEMS
    row_bytes = tc * 4                                   # account at f32 width
    shared_bytes = n_shared * row_bytes * 2              # (1, tc) coefficients
    budget = max(data_budget - shared_bytes, 4 * _MIB)

    # Batch tile: ~2-4 MiB per stream block (HBM roofline sweet spot), bounded
    # by the double-buffered VMEM budget across all batch-indexed streams.
    target_rows = max(1, (3 * _MIB) // row_bytes)
    vmem_rows = max(1, budget // (row_bytes * 2 * n_block_streams))
    tb = min(target_rows, vmem_rows, batch)
    if tb < batch:
        tb = (tb // sublane) * sublane                   # (8,128)-rule alignment
        if tb == 0:
            tb = min(sublane, batch)

    # Encourage >= 4 grid steps (input/output DMA pipelining + megacore split)
    # as long as halving keeps the sublane alignment.
    def steps(tb_):
        return (-(-batch // tb_)) * (-(-chw // tc))

    while steps(tb) < 4 and tb > sublane and (tb // 2) % sublane == 0:
        tb //= 2
    return tb, tc


# ----------------------------------------------------------------------------
# Module wrapper
# ----------------------------------------------------------------------------
class PerSampleBottleneckPallas:
    """Pallas/TPU port of attribution_bottleneck PerSampleBottleneck.forward."""

    def __init__(self, mean, std, sigma, relu=False):
        self.mean = jnp.asarray(mean, jnp.float32)           # (C, H, W)
        self.std = jnp.asarray(std, jnp.float32)             # (C, H, W)
        self.relu = relu
        self.initial_value = 5.0
        C, H, W = self.mean.shape
        self.shape_chw = (C, H, W)
        self.chw = C * H * W
        self.alpha = jnp.full((1, C, H, W), self.initial_value, jnp.float32)
        if sigma is not None and sigma > 0:
            self.kernel_size = int(round(2 * sigma)) * 2 + 1
            self.taps_1d = _gaussian_kernel_1d(self.kernel_size, sigma)
            self.kernel_2d = _gaussian_kernel_2d(self.kernel_size, sigma)
        else:
            # no smoothing -> degenerate 1-tap identity "blur"
            self.kernel_size = 1
            self.taps_1d = np.ones((1,), np.float32)
            self.kernel_2d = np.ones((1, 1), np.float32)
        self.buffer_capacity = None

    def reset_alpha(self):
        self.alpha = jnp.full_like(self.alpha, self.initial_value)
        return self.alpha

    # ------------------------------------------------------------------ prep
    def _prep(self, with_capacity, vmem_limit):
        C, H, W = self.shape_chw
        K = self.kernel_size
        p = (K - 1) // 2
        alpha_chw = self.alpha[0]
        if p > 0:
            alpha_pad = jnp.pad(alpha_chw, ((0, 0), (p, p), (p, p)),
                                mode="reflect")
        else:
            alpha_pad = alpha_chw
        taps = tuple(float(v) for v in self.taps_1d)
        n_out = 6 if with_capacity else 3
        out_shape = tuple(jax.ShapeDtypeStruct((C, H, W), jnp.float32)
                          for _ in range(n_out))
        vspec = pl.BlockSpec(memory_space=pltpu.MemorySpace.VMEM)
        outs = pl.pallas_call(
            functools.partial(prep_kernel, taps=taps, K=K, H=H, W=W,
                              with_capacity=with_capacity),
            out_shape=out_shape,
            in_specs=[vspec, vspec, vspec],
            out_specs=tuple(vspec for _ in range(n_out)),
            compiler_params=pltpu.CompilerParams(vmem_limit_bytes=vmem_limit),
        )(alpha_pad, self.mean, self.std)
        # Contiguous (C,H,W) -> (1, CHW) reshapes are layout metadata only.
        return tuple(o.reshape(1, self.chw) for o in outs)

    # --------------------------------------------------------------- forward
    def __call__(self, r, key=None, *, eps=None, compute_capacity=True,
                 capacity_dtype=jnp.float32):
        """Forward pass.

        If `eps` is given it is used as the N(0,1) noise (reference-parity /
        test mode).  Otherwise eps is drawn with jax.random from `key` in the
        wrapper, mirroring the framework-RNG draw inside the torch forward.
        """
        B, C, H, W = r.shape
        assert (C, H, W) == self.shape_chw
        chw = self.chw
        vmem_limit, data_budget = _vmem_budget()

        if eps is None:
            if key is None:
                raise ValueError("pass `key` (or `eps`) to sample the noise")
            eps_flat = jax.random.normal(key, (B, chw), dtype=jnp.float32)
        else:
            eps_flat = jnp.asarray(eps, jnp.float32).reshape(B, chw)

        coeffs = self._prep(compute_capacity, vmem_limit)

        # Lane-dense layout: pure wrapper-side reshape (layout plumbing only).
        r_flat = r.reshape(B, chw)
        itemsize = np.dtype(r.dtype).itemsize
        sublane = 8 * max(1, 4 // max(1, itemsize))      # 8 for f32, 16 for bf16
        n_shared = len(coeffs)                           # 3 or 6
        n_block_streams = 3 + (1 if compute_capacity else 0)  # r, eps, z, (cap)
        tb, tc = _choose_tiles(B, chw, n_block_streams, n_shared,
                               data_budget, sublane)

        # Grid: column tiles outer, batch tiles inner -> the shared coefficient
        # blocks keep a constant index across the inner loop (revisited, not
        # re-fetched) and only re-DMA when the column tile changes.
        grid = (pl.cdiv(chw, tc), pl.cdiv(B, tb))
        batch_spec = pl.BlockSpec((tb, tc), lambda ci, bi: (bi, ci))
        shared_spec = pl.BlockSpec((1, tc), lambda ci, bi: (0, ci))

        in_specs = [batch_spec, batch_spec] + [shared_spec] * n_shared
        if compute_capacity:
            out_shape = (jax.ShapeDtypeStruct((B, chw), r.dtype),
                         jax.ShapeDtypeStruct((B, chw), capacity_dtype))
            out_specs = (batch_spec, batch_spec)
        else:
            out_shape = jax.ShapeDtypeStruct((B, chw), r.dtype)
            out_specs = batch_spec

        results = pl.pallas_call(
            functools.partial(bottleneck_kernel, relu=self.relu,
                              with_capacity=compute_capacity),
            grid=grid,
            in_specs=in_specs,
            out_specs=out_specs,
            out_shape=out_shape,
            compiler_params=pltpu.CompilerParams(
                dimension_semantics=("parallel", "parallel"),
                vmem_limit_bytes=vmem_limit),
        )(r_flat, eps_flat, *coeffs)

        if compute_capacity:
            z_flat, cap_flat = results
            self.buffer_capacity = cap_flat.reshape(B, C, H, W)
        else:
            z_flat = results
            self.buffer_capacity = None
        return z_flat.reshape(B, C, H, W)


# ----------------------------------------------------------------------------
# Pure-JAX reference (mirrors the PyTorch forward) for verification
# ----------------------------------------------------------------------------
def _reference_smooth(lamb_bchw, kernel_2d):
    K = kernel_2d.shape[0]
    p = (K - 1) // 2
    if p == 0:
        return lamb_bchw
    C = lamb_bchw.shape[1]
    lp = jnp.pad(lamb_bchw, ((0, 0), (0, 0), (p, p), (p, p)), mode="reflect")
    w = jnp.tile(jnp.asarray(kernel_2d, jnp.float32)[None, None], (C, 1, 1, 1))
    return jax.lax.conv_general_dilated(
        lp, w, window_strides=(1, 1), padding="VALID",
        dimension_numbers=("NCHW", "OIHW", "NCHW"), feature_group_count=C)


def reference_forward(r, eps, alpha, mean, std, kernel_2d, relu):
    lamb = jax.nn.sigmoid(alpha)                          # (1, C, H, W)
    lamb = jnp.broadcast_to(lamb, r.shape)
    lamb = _reference_smooth(lamb, kernel_2d)
    r_norm = (r - mean) / std
    noise_var = (1.0 - lamb) ** 2
    mu = r_norm * lamb
    log_var = jnp.log(noise_var)
    noise_std = jnp.exp(0.5 * jnp.clip(log_var, -10.0, 10.0))
    z_norm = mu + noise_std * eps
    cap = -0.5 * (1.0 + log_var - mu ** 2 - jnp.exp(log_var))
    z = z_norm * std + mean
    if relu:
        z = jnp.maximum(z, 0.0)
    return z, cap


if __name__ == "__main__":
    B, C, H, W = 2, 4, 16, 16
    sigma = 1.0

    key = jax.random.PRNGKey(0)
    k_mean, k_std, k_r, k_eps, k_alpha, k_noise = jax.random.split(key, 6)
    mean = jax.random.normal(k_mean, (C, H, W), dtype=jnp.float32)
    std = jax.random.uniform(k_std, (C, H, W), dtype=jnp.float32,
                             minval=0.5, maxval=1.5)
    r = mean + std * jax.random.normal(k_r, (B, C, H, W), dtype=jnp.float32)
    # Non-constant alpha exercises the Gaussian smoothing non-trivially.
    alpha_test = 2.0 + jax.random.normal(k_alpha, (1, C, H, W), jnp.float32)
    eps = jax.random.normal(k_eps, (B, C, H, W), dtype=jnp.float32)

    # --- reference-parity path (external eps), relu off and on ---------------
    for relu in (False, True):
        bn = PerSampleBottleneckPallas(mean, std, sigma, relu=relu)
        bn.alpha = alpha_test
        z = bn(r, eps=eps)
        cap = bn.buffer_capacity
        jax.block_until_ready(z)
        jax.block_until_ready(cap)
        z_ref, cap_ref = reference_forward(r, eps, alpha_test, mean, std,
                                           bn.kernel_2d, relu)
        np.testing.assert_allclose(np.asarray(z), np.asarray(z_ref),
                                   rtol=1e-4, atol=1e-4)
        np.testing.assert_allclose(np.asarray(cap), np.asarray(cap_ref),
                                   rtol=1e-4, atol=1e-4)

    # --- key-driven path: eps drawn in the wrapper (torch forward semantics) --
    bn = PerSampleBottleneckPallas(mean, std, sigma, relu=False)
    bn.alpha = alpha_test
    z2 = bn(r, key=k_noise)
    cap2 = bn.buffer_capacity
    jax.block_until_ready(z2)
    eps2 = jax.random.normal(k_noise, (B, C * H * W),
                             dtype=jnp.float32).reshape(B, C, H, W)
    z2_ref, cap2_ref = reference_forward(r, eps2, alpha_test, mean, std,
                                         bn.kernel_2d, False)
    np.testing.assert_allclose(np.asarray(z2), np.asarray(z2_ref),
                               rtol=1e-4, atol=1e-4)
    np.testing.assert_allclose(np.asarray(cap2), np.asarray(cap2_ref),
                               rtol=1e-4, atol=1e-4)

    # --- no-smoothing (sigma=None) + capacity-skip (one fewer HBM stream) -----
    bn_ns = PerSampleBottleneckPallas(mean, std, None, relu=False)
    bn_ns.alpha = alpha_test
    z3 = bn_ns(r, eps=eps, compute_capacity=False)
    jax.block_until_ready(z3)
    z3_ref, _ = reference_forward(r, eps, alpha_test, mean, std,
                                  bn_ns.kernel_2d, False)
    np.testing.assert_allclose(np.asarray(z3), np.asarray(z3_ref),
                               rtol=1e-4, atol=1e-4)
    assert bn_ns.buffer_capacity is None

    print("KERNEL_OK")
</pallas_src>

<mosaic_0001>
module attributes {stable_mosaic.version = 11 : i64} {
  func.func @prep_kernel(%arg0: memref<4x20x20xf32, #tpu.memory_space<vmem>>, %arg1: memref<4x16x16xf32, #tpu.memory_space<vmem>>, %arg2: memref<4x16x16xf32, #tpu.memory_space<vmem>>, %arg3: memref<4x16x16xf32, #tpu.memory_space<vmem>>, %arg4: memref<4x16x16xf32, #tpu.memory_space<vmem>>, %arg5: memref<4x16x16xf32, #tpu.memory_space<vmem>>, %arg6: memref<4x16x16xf32, #tpu.memory_space<vmem>>, %arg7: memref<4x16x16xf32, #tpu.memory_space<vmem>>, %arg8: memref<4x16x16xf32, #tpu.memory_space<vmem>>) attributes {dimension_semantics = [], scalar_prefetch = 0 : i64, scratch_operands = 0 : i64, tpu.core_type = #tpu.core_type<tc>} {
    %c0 = arith.constant 0 : index
    %c0_0 = arith.constant 0 : index
    %c0_1 = arith.constant 0 : index
    %0 = vector.load %arg0[%c0, %c0_0, %c0_1] : memref<4x20x20xf32, #tpu.memory_space<vmem>>, vector<4x20x20xf32>
    %1 = arith.negf %0 : vector<4x20x20xf32>
    %2 = math.exp %1 : vector<4x20x20xf32>
    %cst = arith.constant 1.000000e+00 : f32
    %3 = vector.broadcast %cst : f32 to vector<4x20x20xf32>
    %4 = arith.addf %3, %2 : vector<4x20x20xf32>
    %5 = arith.divf %3, %4 : vector<4x20x20xf32>
    %6 = vector.extract_strided_slice %5 {offsets = [0, 0, 0], sizes = [4, 16, 20], strides = [1, 1, 1]} : vector<4x20x20xf32> to vector<4x16x20xf32>
    %cst_2 = arith.constant 0.054488685 : f32
    %7 = vector.broadcast %cst_2 : f32 to vector<4x16x20xf32>
    %8 = arith.mulf %7, %6 : vector<4x16x20xf32>
    %9 = vector.extract_strided_slice %5 {offsets = [0, 1, 0], sizes = [4, 16, 20], strides = [1, 1, 1]} : vector<4x20x20xf32> to vector<4x16x20xf32>
    %cst_3 = arith.constant 0.244201347 : f32
    %10 = vector.broadcast %cst_3 : f32 to vector<4x16x20xf32>
    %11 = arith.mulf %10, %9 : vector<4x16x20xf32>
    %12 = arith.addf %8, %11 : vector<4x16x20xf32>
    %13 = vector.extract_strided_slice %5 {offsets = [0, 2, 0], sizes = [4, 16, 20], strides = [1, 1, 1]} : vector<4x20x20xf32> to vector<4x16x20xf32>
    %cst_4 = arith.constant 0.402619958 : f32
    %14 = vector.broadcast %cst_4 : f32 to vector<4x16x20xf32>
    %15 = arith.mulf %14, %13 : vector<4x16x20xf32>
    %16 = arith.addf %12, %15 : vector<4x16x20xf32>
    %17 = vector.extract_strided_slice %5 {offsets = [0, 3, 0], sizes = [4, 16, 20], strides = [1, 1, 1]} : vector<4x20x20xf32> to vector<4x16x20xf32>
    %cst_5 = arith.constant 0.244201347 : f32
    %18 = vector.broadcast %cst_5 : f32 to vector<4x16x20xf32>
    %19 = arith.mulf %18, %17 : vector<4x16x20xf32>
    %20 = arith.addf %16, %19 : vector<4x16x20xf32>
    %21 = vector.extract_strided_slice %5 {offsets = [0, 4, 0], sizes = [4, 16, 20], strides = [1, 1, 1]} : vector<4x20x20xf32> to vector<4x16x20xf32>
    %cst_6 = arith.constant 0.054488685 : f32
    %22 = vector.broadcast %cst_6 : f32 to vector<4x16x20xf32>
    %23 = arith.mulf %22, %21 : vector<4x16x20xf32>
    %24 = arith.addf %20, %23 : vector<4x16x20xf32>
    %25 = vector.extract_strided_slice %24 {offsets = [0, 0, 0], sizes = [4, 16, 16], strides = [1, 1, 1]} : vector<4x16x20xf32> to vector<4x16x16xf32>
    %cst_7 = arith.constant 0.054488685 : f32
    %26 = vector.broadcast %cst_7 : f32 to vector<4x16x16xf32>
    %27 = arith.mulf %26, %25 : vector<4x16x16xf32>
    %28 = vector.extract_strided_slice %24 {offsets = [0, 0, 1], sizes = [4, 16, 16], strides = [1, 1, 1]} : vector<4x16x20xf32> to vector<4x16x16xf32>
    %cst_8 = arith.constant 0.244201347 : f32
    %29 = vector.broadcast %cst_8 : f32 to vector<4x16x16xf32>
    %30 = arith.mulf %29, %28 : vector<4x16x16xf32>
    %31 = arith.addf %27, %30 : vector<4x16x16xf32>
    %32 = vector.extract_strided_slice %24 {offsets = [0, 0, 2], sizes = [4, 16, 16], strides = [1, 1, 1]} : vector<4x16x20xf32> to vector<4x16x16xf32>
    %cst_9 = arith.constant 0.402619958 : f32
    %33 = vector.broadcast %cst_9 : f32 to vector<4x16x16xf32>
    %34 = arith.mulf %33, %32 : vector<4x16x16xf32>
    %35 = arith.addf %31, %34 : vector<4x16x16xf32>
    %36 = vector.extract_strided_slice %24 {offsets = [0, 0, 3], sizes = [4, 16, 16], strides = [1, 1, 1]} : vector<4x16x20xf32> to vector<4x16x16xf32>
    %cst_10 = arith.constant 0.244201347 : f32
    %37 = vector.broadcast %cst_10 : f32 to vector<4x16x16xf32>
    %38 = arith.mulf %37, %36 : vector<4x16x16xf32>
    %39 = arith.addf %35, %38 : vector<4x16x16xf32>
    %40 = vector.extract_strided_slice %24 {offsets = [0, 0, 4], sizes = [4, 16, 16], strides = [1, 1, 1]} : vector<4x16x20xf32> to vector<4x16x16xf32>
    %cst_11 = arith.constant 0.054488685 : f32
    %41 = vector.broadcast %cst_11 : f32 to vector<4x16x16xf32>
    %42 = arith.mulf %41, %40 : vector<4x16x16xf32>
    %43 = arith.addf %39, %42 : vector<4x16x16xf32>
    %c0_12 = arith.constant 0 : index
    %c0_13 = arith.constant 0 : index
    %c0_14 = arith.constant 0 : index
    %44 = vector.load %arg1[%c0_12, %c0_13, %c0_14] : memref<4x16x16xf32, #tpu.memory_space<vmem>>, vector<4x16x16xf32>
    %c0_15 = arith.constant 0 : index
    %c0_16 = arith.constant 0 : index
    %c0_17 = arith.constant 0 : index
    %45 = vector.load %arg2[%c0_15, %c0_16, %c0_17] : memref<4x16x16xf32, #tpu.memory_space<vmem>>, vector<4x16x16xf32>
    %cst_18 = arith.constant 1.000000e+00 : f32
    %46 = vector.broadcast %cst_18 : f32 to vector<4x16x16xf32>
    %47 = arith.subf %46, %43 : vector<4x16x16xf32>
    %48 = arith.mulf %47, %47 : vector<4x16x16xf32>
    %49 = math.log %48 : vector<4x16x16xf32>
    %cst_19 = arith.constant -1.000000e+01 : f32
    %cst_20 = arith.constant 1.000000e+01 : f32
    %50 = vector.broadcast %cst_19 : f32 to vector<4x16x16xf32>
    %51 = arith.maximumf %50, %49 : vector<4x16x16xf32>
    %52 = vector.broadcast %cst_20 : f32 to vector<4x16x16xf32>
    %53 = arith.minimumf %52, %51 : vector<4x16x16xf32>
    %cst_21 = arith.constant 5.000000e-01 : f32
    %54 = vector.broadcast %cst_21 : f32 to vector<4x16x16xf32>
    %55 = arith.mulf %54, %53 : vector<4x16x16xf32>
    %56 = math.exp %55 : vector<4x16x16xf32>
    %c0_22 = arith.constant 0 : index
    %c0_23 = arith.constant 0 : index
    %c0_24 = arith.constant 0 : index
    %57 = vector.load %arg3[%c0_22, %c0_23, %c0_24] : memref<4x16x16xf32, #tpu.memory_space<vmem>>, vector<4x16x16xf32>
    tpu.vector_store %arg3[%c0_22, %c0_23, %c0_24], %43 {strides = array<i32>} : memref<4x16x16xf32, #tpu.memory_space<vmem>>, vector<4x16x16xf32>,
    %58 = arith.mulf %44, %47 : vector<4x16x16xf32>
    %c0_25 = arith.constant 0 : index
    %c0_26 = arith.constant 0 : index
    %c0_27 = arith.constant 0 : index
    %59 = vector.load %arg4[%c0_25, %c0_26, %c0_27] : memref<4x16x16xf32, #tpu.memory_space<vmem>>, vector<4x16x16xf32>
    tpu.vector_store %arg4[%c0_25, %c0_26, %c0_27], %58 {strides = array<i32>} : memref<4x16x16xf32, #tpu.memory_space<vmem>>, vector<4x16x16xf32>,
    %60 = arith.mulf %56, %45 : vector<4x16x16xf32>
    %c0_28 = arith.constant 0 : index
    %c0_29 = arith.constant 0 : index
    %c0_30 = arith.constant 0 : index
    %61 = vector.load %arg5[%c0_28, %c0_29, %c0_30] : memref<4x16x16xf32, #tpu.memory_space<vmem>>, vector<4x16x16xf32>
    tpu.vector_store %arg5[%c0_28, %c0_29, %c0_30], %60 {strides = array<i32>} : memref<4x16x16xf32, #tpu.memory_space<vmem>>, vector<4x16x16xf32>,
    %62 = arith.divf %43, %45 : vector<4x16x16xf32>
    %c0_31 = arith.constant 0 : index
    %c0_32 = arith.constant 0 : index
    %c0_33 = arith.constant 0 : index
    %63 = vector.load %arg6[%c0_31, %c0_32, %c0_33] : memref<4x16x16xf32, #tpu.memory_space<vmem>>, vector<4x16x16xf32>
    tpu.vector_store %arg6[%c0_31, %c0_32, %c0_33], %62 {strides = array<i32>} : memref<4x16x16xf32, #tpu.memory_space<vmem>>, vector<4x16x16xf32>,
    %64 = arith.mulf %44, %62 : vector<4x16x16xf32>
    %c0_34 = arith.constant 0 : index
    %c0_35 = arith.constant 0 : index
    %c0_36 = arith.constant 0 : index
    %65 = vector.load %arg7[%c0_34, %c0_35, %c0_36] : memref<4x16x16xf32, #tpu.memory_space<vmem>>, vector<4x16x16xf32>
    tpu.vector_store %arg7[%c0_34, %c0_35, %c0_36], %64 {strides = array<i32>} : memref<4x16x16xf32, #tpu.memory_space<vmem>>, vector<4x16x16xf32>,
    %cst_37 = arith.constant 1.000000e+00 : f32
    %66 = vector.broadcast %cst_37 : f32 to vector<4x16x16xf32>
    %67 = arith.addf %66, %49 : vector<4x16x16xf32>
    %68 = arith.subf %67, %48 : vector<4x16x16xf32>
    %cst_38 = arith.constant -5.000000e-01 : f32
    %69 = vector.broadcast %cst_38 : f32 to vector<4x16x16xf32>
    %70 = arith.mulf %69, %68 : vector<4x16x16xf32>
    %c0_39 = arith.constant 0 : index
    %c0_40 = arith.constant 0 : index
    %c0_41 = arith.constant 0 : index
    %71 = vector.load %arg8[%c0_39, %c0_40, %c0_41] : memref<4x16x16xf32, #tpu.memory_space<vmem>>, vector<4x16x16xf32>
    tpu.vector_store %arg8[%c0_39, %c0_40, %c0_41], %70 {strides = array<i32>} : memref<4x16x16xf32, #tpu.memory_space<vmem>>, vector<4x16x16xf32>,
    return
  }
}

</mosaic_0001>

<bundles_post_ra>
// kernel: tpu_custom_call.1
= control target key start
LH: loop header
LB: loop body
LE: loop exit
PB: predicated region body
PF: predicated region fallthrough
CT: control target
= control target key end

     0   :  { %14 = vsyncpa [#allocation3], 0  ;;  %s1604_s0 = inlined_call_operand.vmem [shape: f32[4,20,20], index: 0, kind: input, shape index: {}]   ;;  %s1605_s1 = inlined_call_operand.vmem [shape: f32[4,16,16], index: 1, kind: input, shape index: {}]   ;;  %s1606_s2 = inlined_call_operand.vmem [shape: f32[4,16,16], index: 2, kind: input, shape index: {}]   ;;  %s1607_s3 = inlined_call_operand.hbm [shape: f32[4,16,16], index: 3, kind: output, shape index: {0}]   ;;  %s1608_s4 = inlined_call_operand.hbm [shape: f32[4,16,16], index: 4, kind: output, shape index: {1}]   ;;  %s1609_s5 = inlined_call_operand.hbm [shape: f32[4,16,16], index: 5, kind: output, shape index: {2}]   ;;  %s1610_s6 = inlined_call_operand.hbm [shape: f32[4,16,16], index: 6, kind: output, shape index: {3}]   ;;  %s1611_s7 = inlined_call_operand.hbm [shape: f32[4,16,16], index: 7, kind: output, shape index: {4}]   ;;  %s1612_s8 = inlined_call_operand.hbm [shape: f32[4,16,16], index: 8, kind: output, shape index: {5}]  }
   0x1   :  { %15 = vsyncpa [#allocation5], 0 }
   0x2   :  { %16 = vsyncpa [#allocation8], 0  ;;  %v27_v0 = vld [vmem:[%s1604_s0 + $0x18] sm:$0xff]  ;;  %v28_v1 = vld [vmem:[%s1604_s0 + $0x20] sm:$0xff] }
   0x3   :  { %v802_v2 = vmul.f32 -1.442695, %v27_v0  ;;  %v803_v3 = vmul.f32 -1.442695, %v28_v1  ;;  %v24_v4 = vld [vmem:[%s1604_s0] sm:$0xff]  ;;  %v25_v5 = vld [vmem:[%s1604_s0 + $0x8] sm:$0xff] }
   0x4   :  { %v799_v6 = vmul.f32 -1.442695, %v24_v4  ;;  %v29_v7 = vld [vmem:[%s1604_s0 + $0x28] sm:$0xf]  ;;  %v31_v8 = vld [vmem:[%s1604_s0 + $0x38] sm:$0xff]  ;;  %v30_v15 = vld [vmem:[%s1604_s0 + $0x30] sm:$0xff] }
   0x5   :  { %831 = vpow2.f32 %v802_v2  ;;  %v800_v9 = vmul.f32 -1.442695, %v25_v5  ;;  %v804_v10 = vmul.f32 -1.442695, %v29_v7  ;;  %v26_v11 = vld [vmem:[%s1604_s0 + $0x10] sm:$0xf] }
   0x6   :  { %833 = vpow2.f32 %v803_v3  ;;  %v801_v12 = vmul.f32 -1.442695, %v26_v11  ;;  %v32_v13 = vld [vmem:[%s1604_s0 + $0x40] sm:$0xf]  ;;  %v806_v14 = vmul.f32 -1.442695, %v31_v8 }
   0x7   :  { %835 = vpow2.f32 %v799_v6  ;;  %v34_v16 = vld [vmem:[%s1604_s0 + $0x50] sm:$0xff]  ;;  %v807_v17 = vmul.f32 -1.442695, %v32_v13  ;;  %v35_v18 = vld [vmem:[%s1604_s0 + $0x58] sm:$0xf]  ;;  %v33_v20 = vld [vmem:[%s1604_s0 + $0x48] sm:$0xff] }
   0x8   :  { %837 = vpow2.f32 %v800_v9  ;;  %v805_v19 = vmul.f32 -1.442695, %v30_v15 }
   0x9   :  { %839 = vpow2.f32 %v804_v10 }
   0xa   :  { %17 = vsyncpa [#allocation11], 0  ;;  %841 = vpow2.f32 %v801_v12  ;;  %v809_v21 = vmul.f32 -1.442695, %v34_v16  ;;  %v810_v22 = vmul.f32 -1.442695, %v35_v18 }
   0xb   :  { %843 = vpow2.f32 %v806_v14  ;;  %v808_v23 = vmul.f32 -1.442695, %v33_v20  ;;  %vm140_vm0 = vcmask 1046528   ;;  %vm201_vm1 = vcmask 1045504   ;;  %s1067_s0 = smov 127   ;;  %s1068_s29 = smov 126  }
   0xc   :  { %845 = vpow2.f32 %v807_v17  ;;  %vm238_vm2 = vcmask 1044480   ;;  %vm291_vm3 = vcmask 1043456   ;;  %s1069_s30 = smov 125   ;;  %s1070_s9 = smov 124   ;;  %vm592_vm4 = vcmask 130048  }
   0xd   :  { %847 = vpow2.f32 %v805_v19  ;;  %s1071_s16 = smov [#allocation2]   ;;  %s1072_s18 = smov [#allocation7]  }
   0xe   :  { %849 = vpow2.f32 %v809_v21  ;;  %s710_s17 = sshll.u32 %s1071_s16, 4  ;;  %s746_s19 = sshll.u32 %s1072_s18, 4  ;;  %s1434_s17 = int_to_ptr.vmem [resolvable:$true] %s710_s17  ;;  %s1446_s19 = int_to_ptr.vmem [resolvable:$true] %s746_s19 }
   0xf   :  { %v832_v24 = vpop.eup %831  ;;  %851 = vpow2.f32 %v810_v22  ;;  %s1073_s20 = smov [#allocation4]   ;;  %s1074_s24 = smov [#allocation9]  }
  0x10   :  { %v834_v25 = vpop.eup %833  ;;  %v75_v26 = vadd.f32 1.0, %v832_v24  ;;  %853 = vpow2.f32 %v808_v23  ;;  %s1439_s21 = sshll.u32 %s1073_s20, 4  ;;  %s1448_s25 = sshll.u32 %s1074_s24, 4  ;;  %s1475_s21 = int_to_ptr.vmem [resolvable:$true] %s1439_s21  ;;  %s1503_s25 = int_to_ptr.vmem [resolvable:$true] %s1448_s25 }
  0x11   :  { %v836_v27 = vpop.eup %835  ;;  %v76_v28 = vadd.f32 1.0, %v834_v25  ;;  %s927_s26 = scalar_lea.vmem %s1434_s17, 1024  ;;  %p932_p1 = scmp.lt.s32.totalorder %s1434_s17, %s1434_s17 }
  0x12   :  { %v838_v29 = vpop.eup %837  ;;  %855 = vrcp.f32 %v75_v26  ;;  %v72_v30 = vadd.f32 1.0, %v836_v27  ;;  %p928_p0 = scmp.ne.s32.totalorder %s1434_s17, %s927_s26  ;;  %p933_p2 = scmp.lt.s32.totalorder %s927_s26, %s927_s26 }
  0x13   :  { %v840_v31 = vpop.eup %839  ;;  %857 = vrcp.f32 %v76_v28  ;;  %v73_v32 = vadd.f32 1.0, %v838_v29 }
  0x14   :  { %v842_v33 = vpop.eup %841  ;;  %859 = vrcp.f32 %v72_v30  ;;  %v77_v34 = vadd.f32 1.0, %v840_v31  ;;  %p934_p3 = por %p933_p2, %p932_p1 }
  0x15   :  { %v844_v35 = vpop.eup %843  ;;  %v74_v36 = vadd.f32 1.0, %v842_v33  ;;  %861 = vrcp.f32 %v73_v32 }
  0x16   :  { %v846_v37 = vpop.eup %845  ;;  %v79_v38 = vadd.f32 1.0, %v844_v35  ;;  %863 = vrcp.f32 %v77_v34  ;;  %p935_p4 = pnand %p934_p3, %p928_p0 }
  0x17   :  { %v848_v39 = vpop.eup %847  ;;  %v80_v40 = vadd.f32 1.0, %v846_v37  ;;  %865 = vrcp.f32 %v74_v36 }
  0x18   :  { %v850_v41 = vpop.eup %849  ;;  %v78_v42 = vadd.f32 1.0, %v848_v39  ;;  %867 = vrcp.f32 %v79_v38 }
  0x19   :  { %v852_v43 = vpop.eup %851  ;;  %v82_v44 = vadd.f32 1.0, %v850_v41  ;;  %869 = vrcp.f32 %v80_v40 }
  0x1a   :  { %v854_v45 = vpop.eup %853  ;;  %v83_v46 = vadd.f32 1.0, %v852_v43  ;;  %871 = vrcp.f32 %v78_v42 }
  0x1b   :  { %v81_v48 = vadd.f32 1.0, %v854_v45  ;;  %873 = vrcp.f32 %v82_v44 }
  0x1c   :  { %v856_v47 = vpop.eup %855  ;;  %875 = vrcp.f32 %v83_v46 }
  0x1d   :  { %v858_v49 = vpop.eup %857  ;;  %v110_v50 = vmul.f32 0.054488685, %v856_v47  ;;  %v119_v51 = vmul.f32 0.24420135, %v856_v47  ;;  %v180_v52 = vmul.f32 0.40261996, %v856_v47  ;;  %877 = vrcp.f32 %v81_v48 }
  0x1e   :  { %v860_v53 = vpop.eup %859  ;;  %v1160_v54 = vmul.f32 0.054488685, %v858_v49  ;;  %v1162_v55 = vmul.f32 0.24420135, %v858_v49  ;;  %v181_v56 = vmul.f32 0.40261996, %v858_v49 }
  0x1f   :  { %v146_v57 = vrot.slane %v119_v51, 1  ;;  %v207_v58 = vrot.slane %v180_v52, 2  ;;  %v244_v59 = vrot.slane %v119_v51, 3  ;;  %v297_v60 = vrot.slane %v110_v50, 4  ;;  %v862_v61 = vpop.eup %861 }
  0x20   :  { %v147_v62 = vrot.slane %v1162_v55, 1  ;;  %v208_v63 = vrot.slane %v181_v56, 2  ;;  %v245_v0 = vrot.slane %v1162_v55, 3  ;;  %v298_v1 = vrot.slane %v1160_v54, 4  ;;  %v864_v5 = vpop.eup %863 }
  0x21   :  { %v108_v2 = vmul.f32 0.054488685, %v860_v53  ;;  %v1167_v3 = vmul.f32 0.054488685, %v862_v61  ;;  %v116_v4 = vmul.f32 0.24420135, %v860_v53  ;;  %v866_v10 = vpop.eup %865 }
  0x22   :  { %v148_v6 = vsel %vm140_vm0, %v146_v57, %v147_v62  ;;  %v209_v7 = vsel %vm201_vm1, %v207_v58, %v208_v63  ;;  %v246_v8 = vsel %vm238_vm2, %v244_v59, %v245_v0  ;;  %v299_v9 = vsel %vm291_vm3, %v297_v60, %v298_v1  ;;  %v868_v15 = vpop.eup %867 }
  0x23   :  { %v171_v11 = vadd.f32 %v148_v6, %v110_v50  ;;  %v117_v12 = vmul.f32 0.24420135, %v862_v61  ;;  %v141_v13 = vrot.slane %v116_v4, 1  ;;  %v177_v14 = vmul.f32 0.40261996, %v860_v53  ;;  %v870_v20 = vpop.eup %869 }
  0x24   :  { %v178_v16 = vmul.f32 0.40261996, %v862_v61  ;;  %v239_v17 = vrot.slane %v116_v4, 3  ;;  %v292_v18 = vrot.slane %v108_v2, 4  ;;  %v293_v19 = vrot.slane %v1167_v3, 4  ;;  %v1174_v25 = vpop.eup %871 }
  0x25   :  { %v232_v21 = vadd.f32 %v209_v7, %v171_v11  ;;  %v142_v22 = vrot.slane %v117_v12, 1  ;;  %v202_v23 = vrot.slane %v177_v14, 2  ;;  %v240_v24 = vrot.slane %v117_v12, 3  ;;  %v1177_v30 = vpop.eup %873 }
  0x26   :  { %v203_v26 = vrot.slane %v178_v16, 2  ;;  %v294_v27 = vsel %vm291_vm3, %v292_v18, %v293_v19  ;;  %v121_v28 = vmul.f32 0.24420135, %v864_v5  ;;  %v182_v29 = vmul.f32 0.40261996, %v864_v5  ;;  %v1181_v35 = vpop.eup %875 }
  0x27   :  { %v269_v31 = vadd.f32 %v246_v8, %v232_v21  ;;  %v143_v32 = vsel %vm140_vm0, %v141_v13, %v142_v22  ;;  %v241_v33 = vsel %vm238_vm2, %v239_v17, %v240_v24  ;;  %v276_v34 = vmul.f32 0.054488685, %v864_v5  ;;  %v1188_v48 = vpop.eup %877 }
  0x28   :  { %v169_v36 = vadd.f32 %v143_v32, %v108_v2  ;;  %v204_v37 = vsel %vm201_vm1, %v202_v23, %v203_v26  ;;  %v149_v38 = vrot.slane %v121_v28, 1  ;;  %v210_v39 = vrot.slane %v182_v29, 2 }
  0x29   :  { %v1184_v40 = vadd.f32 %v299_v9, %v269_v31  ;;  %v247_v41 = vrot.slane %v121_v28, 3  ;;  %v300_v42 = vrot.slane %v276_v34, 4  ;;  %v118_v43 = vmul.f32 0.24420135, %v866_v10 }
  0x2a   :  { %v230_v44 = vadd.f32 %v204_v37, %v169_v36  ;;  %v150_v45 = vsel %vm140_vm0, %v147_v62, %v149_v38  ;;  %v211_v46 = vsel %vm201_vm1, %v208_v63, %v210_v39  ;;  %v179_v47 = vmul.f32 0.40261996, %v866_v10 }
  0x2b   :  { %v1191_v49 = vmul.f32 0.24420135, %v1184_v40  ;;  %v172_v50 = vadd.f32 %v150_v45, %v1160_v54  ;;  %v248_v51 = vsel %vm238_vm2, %v245_v0, %v247_v41  ;;  %v301_v52 = vsel %vm291_vm3, %v298_v1, %v300_v42 }
  0x2c   :  { %v267_v53 = vadd.f32 %v241_v33, %v230_v44  ;;  %v144_v55 = vrot.slane %v118_v43, 1  ;;  %v205_v56 = vrot.slane %v179_v47, 2  ;;  %v242_v57 = vrot.slane %v118_v43, 3 }
  0x2d   :  { %356 = vrot.lane.b32.xlu1 %v1191_v49, %s1067_s0  ;;  %v233_v58 = vadd.f32 %v211_v46, %v172_v50  ;;  %v275_v59 = vmul.f32 0.054488685, %v866_v10  ;;  %v113_v60 = vmul.f32 0.054488685, %v868_v15  ;;  %v123_v61 = vmul.f32 0.24420135, %v868_v15 }
  0x2e   :  { %v1198_v62 = vadd.f32 %v294_v27, %v267_v53  ;;  %v145_v54 = vsel %vm140_vm0, %v142_v22, %v144_v55  ;;  %v206_v63 = vsel %vm201_vm1, %v203_v26, %v205_v56  ;;  %v243_v0 = vsel %vm238_vm2, %v240_v24, %v242_v57 }
  0x2f   :  { %v270_v1 = vadd.f32 %v248_v51, %v233_v58  ;;  %v170_v2 = vadd.f32 %v145_v54, %v1167_v3  ;;  %v295_v4 = vrot.slane %v275_v59, 4  ;;  %v124_v5 = vmul.f32 0.24420135, %v870_v20 }
  0x30   :  { %v1205_v6 = vmul.f32 0.24420135, %v1198_v62  ;;  %v152_v7 = vrot.slane %v123_v61, 1  ;;  %v184_v8 = vmul.f32 0.40261996, %v868_v15  ;;  %v250_v9 = vrot.slane %v123_v61, 3 }
  0x31   :  { %v1207_v10 = vadd.f32 %v301_v52, %v270_v1  ;;  %v231_v11 = vadd.f32 %v206_v63, %v170_v2  ;;  %v296_v12 = vsel %vm291_vm3, %v293_v19, %v295_v4  ;;  %v154_v13 = vrot.slane %v124_v5, 1 }
  0x32   :  { %352 = vrot.lane.b32.xlu0 %v1205_v6, %s1067_s0  ;;  %v185_v14 = vmul.f32 0.40261996, %v870_v20  ;;  %v213_v16 = vrot.slane %v184_v8, 2  ;;  %v252_v3 = vrot.slane %v124_v5, 3  ;;  %v277_v17 = vmul.f32 0.054488685, %v870_v20 }
  0x33   :  { %v1213_v18 = vmul.f32 0.24420135, %v1207_v10  ;;  %v268_v21 = vadd.f32 %v243_v0, %v231_v11  ;;  %v155_v15 = vsel %vm140_vm0, %v152_v7, %v154_v13  ;;  %v303_v22 = vrot.slane %v113_v60, 4 }
  0x34   :  { %v174_v23 = vadd.f32 %v155_v15, %v113_v60  ;;  %v215_v24 = vrot.slane %v185_v14, 2  ;;  %v253_v26 = vsel %vm238_vm2, %v250_v9, %v252_v3  ;;  %v305_v19 = vrot.slane %v277_v17, 4 }
  0x35   :  { %358 = vrot.lane.b32.xlu1 %v1213_v18, %s1067_s0  ;;  %v1219_v27 = vadd.f32 %v296_v12, %v268_v21  ;;  %v112_v28 = vmul.f32 0.054488685, %v1174_v25  ;;  %v122_v20 = vmul.f32 0.24420135, %v1174_v25  ;;  %v183_v29 = vmul.f32 0.40261996, %v1174_v25 }
  0x36   :  { %v216_v31 = vsel %vm201_vm1, %v213_v16, %v215_v24  ;;  %v306_v32 = vsel %vm291_vm3, %v303_v22, %v305_v19  ;;  %v115_v33 = vmul.f32 0.054488685, %v1177_v30  ;;  %v126_v34 = vmul.f32 0.24420135, %v1177_v30 }
  0x37   :  { %v1229_v36 = vmul.f32 0.24420135, %v1219_v27  ;;  %v235_v37 = vadd.f32 %v216_v31, %v174_v23  ;;  %v151_v38 = vrot.slane %v122_v20, 1  ;;  %v212_v39 = vrot.slane %v183_v29, 2 }
  0x38   :  { %v249_v41 = vrot.slane %v122_v20, 3  ;;  %v302_v42 = vrot.slane %v112_v28, 4  ;;  %v127_v43 = vmul.f32 0.24420135, %v1181_v35  ;;  %v157_v44 = vrot.slane %v126_v34, 1 }
  0x39   :  { %354 = vrot.lane.b32.xlu0 %v1229_v36, %s1067_s0  ;;  %v272_v25 = vadd.f32 %v253_v26, %v235_v37  ;;  %v153_v45 = vsel %vm140_vm0, %v151_v38, %v152_v7  ;;  %v214_v46 = vsel %vm201_vm1, %v212_v39, %v213_v16  ;;  %v187_v47 = vmul.f32 0.40261996, %v1177_v30 }
  0x3a   :  { %v173_v50 = vadd.f32 %v153_v45, %v112_v28  ;;  %v251_v51 = vsel %vm238_vm2, %v249_v41, %v250_v9  ;;  %v304_v52 = vsel %vm291_vm3, %v302_v42, %v303_v22  ;;  %v159_v53 = vrot.slane %v127_v43, 1 }
  0x3b   :  { %v1239_v55 = vadd.f32 %v306_v32, %v272_v25  ;;  %v188_v56 = vmul.f32 0.40261996, %v1181_v35  ;;  %v218_v57 = vrot.slane %v187_v47, 2  ;;  %v255_v58 = vrot.slane %v126_v34, 3 }
  0x3c   :  { %v234_v59 = vadd.f32 %v214_v46, %v173_v50  ;;  %v160_v60 = vsel %vm140_vm0, %v157_v44, %v159_v53  ;;  %v257_v61 = vrot.slane %v127_v43, 3  ;;  %v278_v54 = vmul.f32 0.054488685, %v1181_v35 }
  0x3d   :  { %v341_v30 = vmul.f32 0.24420135, %v1239_v55  ;;  %v176_v63 = vadd.f32 %v160_v60, %v115_v33  ;;  %v220_v0 = vrot.slane %v188_v56, 2  ;;  %v308_v1 = vrot.slane %v115_v33, 4 }
  0x3e   :  { %v271_v2 = vadd.f32 %v251_v51, %v234_v59  ;;  %v310_v4 = vrot.slane %v278_v54, 4  ;;  %v258_v7 = vsel %vm238_vm2, %v255_v58, %v257_v61  ;;  %v125_v8 = vmul.f32 0.24420135, %v1188_v48 }
  0x3f   :  { %362 = vrot.lane.b32.xlu1 %v341_v30, %s1067_s0  ;;  %v221_v5 = vsel %vm201_vm1, %v218_v57, %v220_v0  ;;  %v186_v9 = vmul.f32 0.40261996, %v1188_v48  ;;  %v114_v35 = vmul.f32 0.054488685, %v1188_v48  ;;  %v385_v31 = vmul.f32 0.40261996, %v1219_v27 }
  0x40   :  { %v324_v11 = vadd.f32 %v304_v52, %v271_v2  ;;  %v237_v12 = vadd.f32 %v221_v5, %v176_v63  ;;  %v311_v13 = vsel %vm291_vm3, %v308_v1, %v310_v4  ;;  %v156_v14 = vrot.slane %v125_v8, 1  ;;  %v1310_v4 = vld [vmem:[%s1606_s2] sm:$0xff] }
  0x41   :  { %v217_v16 = vrot.slane %v186_v9, 2  ;;  %v254_v3 = vrot.slane %v125_v8, 3  ;;  %v307_v23 = vrot.slane %v114_v35, 4  ;;  %v387_v34 = vmul.f32 0.40261996, %v1207_v10  ;;  %v1321_v9 = vld [vmem:[%s1606_s2 + $0x28] sm:$0xff] }
  0x42   :  { %v340_v17 = vmul.f32 0.24420135, %v324_v11  ;;  %v274_v21 = vadd.f32 %v258_v7, %v237_v12  ;;  %v158_v15 = vsel %vm140_vm0, %v156_v14, %v157_v44  ;;  %v384_v37 = vmul.f32 0.40261996, %v1198_v62 }
  0x43   :  { %v219_v22 = vsel %vm201_vm1, %v217_v16, %v218_v57  ;;  %v175_v26 = vadd.f32 %v158_v15, %v114_v35  ;;  %v256_v19 = vsel %vm238_vm2, %v254_v3, %v255_v58  ;;  %v309_v20 = vsel %vm291_vm3, %v307_v23, %v308_v1  ;;  %v1305_v1 = vld [vmem:[%s1606_s2 + $0x18] sm:$0xff]  ;;  %v1328_v35 = vld [vmem:[%s1606_s2 + $0x10] sm:$0xff]  ;;  %v1339_v15 = vld [vmem:[%s1606_s2 + $0x20] sm:$0xff] }
  0x44   :  { %360 = vrot.lane.b32.xlu0 %v340_v17, %s1067_s0  ;;  %v327_v24 = vadd.f32 %v311_v13, %v274_v21  ;;  %v389_v38 = vmul.f32 0.40261996, %v1239_v55  ;;  %v386_v39 = vmul.f32 0.40261996, %v1184_v40  ;;  %v388_v42 = vmul.f32 0.40261996, %v324_v11 }
  0x45   :  { %v236_v48 = vadd.f32 %v219_v22, %v175_v26  ;;  %v329_v44 = vmul.f32 0.054488685, %v1219_v27  ;;  %v331_v25 = vmul.f32 0.054488685, %v1207_v10  ;;  %v328_v45 = vmul.f32 0.054488685, %v1198_v62 }
  0x46   :  { %v343_v28 = vmul.f32 0.24420135, %v327_v24  ;;  %v391_v41 = vmul.f32 0.40261996, %v327_v24  ;;  %v1334_v16 = vld [vmem:[%s1606_s2 + $0x38] sm:$0xff] }
  0x47   :  { %v273_v29 = vadd.f32 %v256_v19, %v236_v48 }
  0x48   :  { %366 = vrot.lane.b32.xlu1 %v343_v28, %s1067_s0 }
  0x49   :  { %v326_v32 = vadd.f32 %v309_v20, %v273_v29 }
  0x4b   :  { %v342_v33 = vmul.f32 0.24420135, %v326_v32  ;;  %v390_v43 = vmul.f32 0.40261996, %v326_v32  ;;  %v1285_v62 = vmul.f32 0.054488685, %v326_v32 }
  0x4c   :  { %402 = vrot.lane.b32.xlu1 %v385_v31, %s1068_s29 }
  0x4d   :  { %364 = vrot.lane.b32.xlu0 %v342_v33, %s1067_s0 }
  0x50   :  { %406 = vrot.lane.b32.xlu1 %v387_v34, %s1068_s29 }
  0x51   :  { %400 = vrot.lane.b32.xlu0 %v384_v37, %s1068_s29 }
  0x54   :  { %410 = vrot.lane.b32.xlu1 %v389_v38, %s1068_s29 }
  0x55   :  { %404 = vrot.lane.b32.xlu0 %v386_v39, %s1068_s29 }
  0x58   :  { %414 = vrot.lane.b32.xlu1 %v391_v41, %s1068_s29 }
  0x59   :  { %408 = vrot.lane.b32.xlu0 %v388_v42, %s1068_s29 }
  0x5c   :  { %434 = vrot.lane.b32.xlu1 %v1229_v36, %s1069_s30  ;;  %v1272_v36 = vmul.f32 0.054488685, %v1239_v55 }
  0x5d   :  { %412 = vrot.lane.b32.xlu0 %v390_v43, %s1068_s29 }
  0x60   :  { %438 = vrot.lane.b32.xlu1 %v1213_v18, %s1069_s30  ;;  %v1281_v18 = vmul.f32 0.054488685, %v324_v11 }
  0x61   :  { %432 = vrot.lane.b32.xlu0 %v1205_v6, %s1069_s30  ;;  %v1275_v6 = vmul.f32 0.054488685, %v1184_v40 }
  0x64   :  { %442 = vrot.lane.b32.xlu1 %v341_v30, %s1069_s30  ;;  %v1299_v30 = vld [vmem:[%s1606_s2 + $0x8] sm:$0xff] }
  0x65   :  { %436 = vrot.lane.b32.xlu0 %v1191_v49, %s1069_s30  ;;  %v1278_v49 = vmul.f32 0.054488685, %v327_v24  ;;  %879 = vrcp.f32 %v1299_v30  ;;  %v1345_v24 = vld [vmem:[%s1606_s2 + $0x30] sm:$0xff] }
  0x66   :  { %881 = vrcp.f32 %v1305_v1 }
  0x67   :  { %883 = vrcp.f32 %v1310_v4 }
  0x68   :  { %446 = vrot.lane.b32.xlu1 %v343_v28, %s1069_s30  ;;  %885 = vrcp.f32 %v1321_v9  ;;  %v505_v28 = vld [vmem:[%s1605_s1 + $0x8] sm:$0xff] }
  0x69   :  { %440 = vrot.lane.b32.xlu0 %v340_v17, %s1069_s30  ;;  %887 = vrcp.f32 %v1328_v35 }
  0x6a   :  { %889 = vrcp.f32 %v1334_v16 }
  0x6b   :  { %891 = vrcp.f32 %v1339_v15 }
  0x6c   :  { %474 = vrot.lane.b32.xlu1 %v329_v44, %s1070_s9  ;;  %893 = vrcp.f32 %v1345_v24 }
  0x6d   :  { %444 = vrot.lane.b32.xlu0 %v342_v33, %s1069_s30 }
  0x6f   :  { %v880_v3 = vpop.eup %879 }
  0x70   :  { %478 = vrot.lane.b32.xlu1 %v331_v25, %s1070_s9  ;;  %v882_v31 = vpop.eup %881 }
  0x71   :  { %472 = vrot.lane.b32.xlu0 %v328_v45, %s1070_s9  ;;  %v884_v43 = vpop.eup %883 }
  0x74   :  { %482 = vrot.lane.b32.xlu1 %v1272_v36, %s1070_s9 }
  0x75   :  { %476 = vrot.lane.b32.xlu0 %v1275_v6, %s1070_s9 }
  0x78   :  { %486 = vrot.lane.b32.xlu1 %v1278_v49, %s1070_s9 }
  0x79   :  { %480 = vrot.lane.b32.xlu0 %v1281_v18, %s1070_s9 }
  0x7d   :  { %484 = vrot.lane.b32.xlu0 %v1285_v62, %s1070_s9 }
  0x9f   :  { %v357_v10 = vpop.permute.xlu1 %356 }
  0xa0   :  { %v378_v32 = vadd.f32 %v357_v10, %v1275_v6  ;;  %v507_v10 = vld [vmem:[%s1605_s1 + $0x18] sm:$0xff] }
  0xa4   :  { %v353_v27 = vpop.permute.xlu0 %352 }
  0xa5   :  { %v376_v17 = vadd.f32 %v353_v27, %v328_v45 }
  0xa7   :  { %v359_v40 = vpop.permute.xlu1 %358 }
  0xa8   :  { %v379_v13 = vadd.f32 %v359_v40, %v331_v25 }
  0xab   :  { %v355_v46 = vpop.permute.xlu0 %354 }
  0xac   :  { %v377_v7 = vadd.f32 %v355_v46, %v329_v44 }
  0xb1   :  { %v363_v47 = vpop.permute.xlu1 %362 }
  0xb2   :  { %v381_v33 = vadd.f32 %v363_v47, %v1272_v36 }
  0xb6   :  { %v361_v50 = vpop.permute.xlu0 %360 }
  0xb7   :  { %v380_v44 = vadd.f32 %v361_v50, %v1281_v18  ;;  %v504_v50 = vld [vmem:[%s1605_s1] sm:$0xff] }
  0xba   :  { %v367_v51 = vpop.permute.xlu1 %366 }
  0xbb   :  { %v383_v25 = vadd.f32 %v367_v51, %v1278_v49 }
  0xbe   :  { %v403_v52 = vpop.permute.xlu1 %402 }
  0xbf   :  { %v365_v53 = vpop.permute.xlu0 %364  ;;  %v425_v11 = vadd.f32 %v403_v52, %v377_v7  ;;  %v886_v52 = vpop.eup %885 }
  0xc0   :  { %v382_v45 = vadd.f32 %v365_v53, %v1285_v62 }
  0xc2   :  { %v407_v55 = vpop.permute.xlu1 %406 }
  0xc3   :  { %v401_v56 = vpop.permute.xlu0 %400  ;;  %v427_v22 = vadd.f32 %v407_v55, %v379_v13 }
  0xc4   :  { %v424_v26 = vadd.f32 %v401_v56, %v376_v17 }
  0xc6   :  { %v411_v57 = vpop.permute.xlu1 %410 }
  0xc7   :  { %v1288_v58 = vpop.permute.xlu0 %404  ;;  %v429_v6 = vadd.f32 %v411_v57, %v381_v33 }
  0xc8   :  { %v426_v49 = vadd.f32 %v1288_v58, %v378_v32  ;;  %v511_v32 = vld [vmem:[%s1605_s1 + $0x38] sm:$0xff] }
  0xca   :  { %v1290_v59 = vpop.permute.xlu1 %414 }
  0xcb   :  { %v1292_v60 = vpop.permute.xlu0 %408  ;;  %v431_v46 = vadd.f32 %v1290_v59, %v383_v25 }
  0xcc   :  { %v428_v62 = vadd.f32 %v1292_v60, %v380_v44  ;;  %v508_v44 = vld [vmem:[%s1605_s1 + $0x20] sm:$0xff] }
  0xce   :  { %v435_v61 = vpop.permute.xlu1 %434 }
  0xcf   :  { %v1294_v54 = vpop.permute.xlu0 %412  ;;  %v457_v14 = vadd.f32 %v435_v61, %v425_v11 }
  0xd2   :  { %v439_v63 = vpop.permute.xlu1 %438 }
  0xd3   :  { %v433_v0 = vpop.permute.xlu0 %432  ;;  %v459_v48 = vadd.f32 %v439_v63, %v427_v22  ;;  %v430_v22 = vadd.f32 %v1294_v54, %v382_v45 }
  0xd4   :  { %v456_v34 = vadd.f32 %v433_v0, %v424_v26  ;;  %v888_v0 = vpop.eup %887  ;;  %v506_v26 = vld [vmem:[%s1605_s1 + $0x10] sm:$0xff] }
  0xd5   :  { %v890_v13 = vpop.eup %889 }
  0xd6   :  { %v443_v2 = vpop.permute.xlu1 %442 }
  0xd7   :  { %v1312_v5 = vpop.permute.xlu0 %436  ;;  %v461_v47 = vadd.f32 %v443_v2, %v429_v6 }
  0xd8   :  { %v458_v58 = vadd.f32 %v1312_v5, %v426_v49  ;;  %v509_v5 = vld [vmem:[%s1605_s1 + $0x28] sm:$0xff] }
  0xda   :  { %v1315_v8 = vpop.permute.xlu1 %446 }
  0xdb   :  { %v1323_v12 = vpop.permute.xlu0 %440  ;;  %v463_v59 = vadd.f32 %v1315_v8, %v431_v46 }
  0xde   :  { %v475_v21 = vpop.permute.xlu1 %474 }
  0xdf   :  { %v497_v23 = vadd.f32 %v475_v21, %v457_v14  ;;  %v1347_v19 = vpop.permute.xlu0 %444  ;;  %v892_v21 = vpop.eup %891 }
  0xe1   :  { %v521_v20 = vsub.f32 1.0, %v497_v23  ;;  %594 = vst.msk [vmem:[#allocation2 + $0x8] sm:$0xff] %vm592_vm4, %v497_v23  ;;  %v636_v29 = vmul.f32 %v880_v3, %v497_v23  ;;  %v460_v23 = vadd.f32 %v1323_v12, %v428_v62 }
  0xe2   :  { %v479_v37 = vpop.permute.xlu1 %478 }
  0xe3   :  { %v1358_v38 = vmul.f32 %v521_v20, %v521_v20  ;;  %v602_v39 = vmul.f32 %v521_v20, %v505_v28  ;;  %650 = vst.msk [vmem:[#allocation7 + $0x8] sm:$0xff] %vm592_vm4, %v636_v29  ;;  %v658_v41 = vmul.f32 %v636_v29, %v505_v28  ;;  %v499_v42 = vadd.f32 %v479_v37, %v459_v48  ;;  %v473_v36 = vpop.permute.xlu0 %472  ;;  %v1401_v48 = vpop.eup %893 }
  0xe4   :  { %v496_v27 = vadd.f32 %v473_v36, %v456_v34 }
  0xe5   :  { %895 = vlog2.f32 %v1358_v38  ;;  %610 = vst.msk [vmem:[#allocation4 + $0x8] sm:$0xff] %vm592_vm4, %v602_v39  ;;  %666 = vst.msk [vmem:[#allocation9 + $0x8] sm:$0xff] %vm592_vm4, %v658_v41  ;;  %v523_v40 = vsub.f32 1.0, %v499_v42  ;;  %v640_v18 = vmul.f32 %v882_v31, %v499_v42 }
  0xe6   :  { %596 = vst.msk [vmem:[#allocation2 + $0x18] sm:$0xff] %vm592_vm4, %v499_v42  ;;  %v483_v51 = vpop.permute.xlu1 %482  ;;  %v520_v53 = vsub.f32 1.0, %v496_v27  ;;  %593 = vst.msk [vmem:[#allocation2] sm:$0xff] %vm592_vm4, %v496_v27  ;;  %v634_v55 = vmul.f32 %v884_v43, %v496_v27  ;;  %v462_v27 = vadd.f32 %v1347_v19, %v430_v22 }
  0xe7   :  { %v1378_v56 = vmul.f32 %v523_v40, %v523_v40  ;;  %v604_v57 = vmul.f32 %v523_v40, %v507_v10  ;;  %652 = vst.msk [vmem:[#allocation7 + $0x18] sm:$0xff] %vm592_vm4, %v640_v18  ;;  %v660_v60 = vmul.f32 %v640_v18, %v507_v10  ;;  %v477_v61 = vpop.permute.xlu0 %476  ;;  %v501_v63 = vadd.f32 %v483_v51, %v461_v47 }
  0xe8   :  { %v1383_v2 = vmul.f32 %v520_v53, %v520_v53  ;;  %v601_v7 = vmul.f32 %v520_v53, %v504_v50  ;;  %649 = vst.msk [vmem:[#allocation7] sm:$0xff] %vm592_vm4, %v634_v55  ;;  %v657_v11 = vmul.f32 %v634_v55, %v504_v50  ;;  %v498_v8 = vadd.f32 %v477_v61, %v458_v58  ;;  %v510_v58 = vld [vmem:[%s1605_s1 + $0x30] sm:$0xff] }
  0xe9   :  { %897 = vlog2.f32 %v1378_v56  ;;  %612 = vst.msk [vmem:[#allocation4 + $0x18] sm:$0xff] %vm592_vm4, %v604_v57  ;;  %668 = vst.msk [vmem:[#allocation9 + $0x18] sm:$0xff] %vm592_vm4, %v660_v60  ;;  %v525_v14 = vsub.f32 1.0, %v501_v63  ;;  %v644_v3 = vmul.f32 %v886_v52, %v501_v63 }
  0xea   :  { %598 = vst.msk [vmem:[#allocation2 + $0x28] sm:$0xff] %vm592_vm4, %v501_v63  ;;  %v487_v17 = vpop.permute.xlu1 %486  ;;  %899 = vlog2.f32 %v1383_v2  ;;  %609 = vst.msk [vmem:[#allocation4] sm:$0xff] %vm592_vm4, %v601_v7  ;;  %v522_v20 = vsub.f32 1.0, %v498_v8  ;;  %v638_v29 = vmul.f32 %v888_v0, %v498_v8 }
  0xeb   :  { %665 = vst.msk [vmem:[#allocation9] sm:$0xff] %vm592_vm4, %v657_v11  ;;  %v503_v28 = vadd.f32 %v487_v17, %v463_v59  ;;  %595 = vst.msk [vmem:[#allocation2 + $0x10] sm:$0xff] %vm592_vm4, %v498_v8  ;;  %v1404_v54 = vmul.f32 %v525_v14, %v525_v14  ;;  %v606_v12 = vmul.f32 %v525_v14, %v509_v5  ;;  %v481_v31 = vpop.permute.xlu0 %480 }
  0xec   :  { %654 = vst.msk [vmem:[#allocation7 + $0x28] sm:$0xff] %vm592_vm4, %v644_v3  ;;  %v662_v33 = vmul.f32 %v644_v3, %v509_v5  ;;  %v500_v34 = vadd.f32 %v481_v31, %v460_v23  ;;  %v1411_v41 = vmul.f32 %v522_v20, %v522_v20  ;;  %v603_v42 = vmul.f32 %v522_v20, %v506_v26 }
  0xed   :  { %v527_v37 = vsub.f32 1.0, %v503_v28  ;;  %600 = vst.msk [vmem:[#allocation2 + $0x38] sm:$0xff] %vm592_vm4, %v503_v28  ;;  %v648_v39 = vmul.f32 %v890_v13, %v503_v28  ;;  %651 = vst.msk [vmem:[#allocation7 + $0x10] sm:$0xff] %vm592_vm4, %v638_v29  ;;  %v659_v43 = vmul.f32 %v638_v29, %v506_v26  ;;  %901 = vlog2.f32 %v1404_v54 }
  0xee   :  { %614 = vst.msk [vmem:[#allocation4 + $0x28] sm:$0xff] %vm592_vm4, %v606_v12  ;;  %670 = vst.msk [vmem:[#allocation9 + $0x28] sm:$0xff] %vm592_vm4, %v662_v33  ;;  %v524_v45 = vsub.f32 1.0, %v500_v34  ;;  %v642_v6 = vmul.f32 %v892_v21, %v500_v34  ;;  %903 = vlog2.f32 %v1411_v41 }
  0xef   :  { %v896_v25 = vpop.eup %895  ;;  %597 = vst.msk [vmem:[#allocation2 + $0x20] sm:$0xff] %vm592_vm4, %v500_v34  ;;  %v1421_v36 = vmul.f32 %v527_v37, %v527_v37  ;;  %v608_v10 = vmul.f32 %v527_v37, %v511_v32  ;;  %656 = vst.msk [vmem:[#allocation7 + $0x38] sm:$0xff] %vm592_vm4, %v648_v39  ;;  %v664_v18 = vmul.f32 %v648_v39, %v511_v32  ;;  %v485_v49 = vpop.permute.xlu0 %484 }
  0xf0   :  { %v539_v40 = vmul.f32 0.6931472, %v896_v25  ;;  %611 = vst.msk [vmem:[#allocation4 + $0x10] sm:$0xff] %vm592_vm4, %v603_v42  ;;  %667 = vst.msk [vmem:[#allocation9 + $0x10] sm:$0xff] %vm592_vm4, %v659_v43  ;;  %v1428_v62 = vmul.f32 %v524_v45, %v524_v45  ;;  %v605_v46 = vmul.f32 %v524_v45, %v508_v44  ;;  %v661_v47 = vmul.f32 %v642_v6, %v508_v44 }
  0xf1   :  { %653 = vst.msk [vmem:[#allocation7 + $0x20] sm:$0xff] %vm592_vm4, %v642_v6  ;;  %905 = vlog2.f32 %v1421_v36  ;;  %616 = vst.msk [vmem:[#allocation4 + $0x38] sm:$0xff] %vm592_vm4, %v608_v10  ;;  %v502_v51 = vadd.f32 %v485_v49, %v462_v27 }
  0xf2   :  { %v812_v19 = vclamps-f32 %v539_v40, 10.0  ;;  %v674_v50 = vadd.f32 1.0, %v539_v40  ;;  %672 = vst.msk [vmem:[#allocation9 + $0x38] sm:$0xff] %vm592_vm4, %v664_v18  ;;  %907 = vlog2.f32 %v1428_v62  ;;  %613 = vst.msk [vmem:[#allocation4 + $0x20] sm:$0xff] %vm592_vm4, %v605_v46 }
  0xf3   :  { %v898_v52 = vpop.eup %897  ;;  %669 = vst.msk [vmem:[#allocation9 + $0x20] sm:$0xff] %vm592_vm4, %v661_v47  ;;  %v526_v59 = vsub.f32 1.0, %v502_v51  ;;  %599 = vst.msk [vmem:[#allocation2 + $0x30] sm:$0xff] %vm592_vm4, %v502_v51  ;;  %v646_v61 = vmul.f32 %v1401_v48, %v502_v51 }
  0xf4   :  { %v569_v53 = vmul.f32 0.5, %v812_v19  ;;  %v682_v55 = vsub.f32 %v674_v50, %v1358_v38  ;;  %v543_v57 = vmul.f32 0.6931472, %v898_v52  ;;  %v900_v60 = vpop.eup %899 }
  0xf5   :  { %938 = shalt.err (!%p935_p4)
}
  0xf6   :  { %s939_s2 = scalar_lea.hbm %s1607_s3, 1024 }
  0xf7   :  { %p940_p5 = scmp.ne.s32.totalorder %s1607_s3, %s939_s2  ;;  %p943_p6 = scmp.lt.u32.totalorder %s939_s2, %s1607_s3 }
  0xf9   :  { %p945_p7 = pnand %p943_p6, %p940_p5 }
  0xfb   :  { %948 = shalt.err (!%p945_p7)
}
  0xfc   :  { %s1075_s9 = smov 128   ;;  %s1076_s10 = smov 8   ;;  %v578_v38 = vmul.f32 1.442695, %v569_v53  ;;  %v690_v63 = vmul.f32 -0.5, %v682_v55  ;;  %v814_v7 = vclamps-f32 %v543_v57, 10.0  ;;  %v1471_v5 = vmul.f32 %v526_v59, %v526_v59  ;;  %v902_v14 = vpop.eup %901 }
  0xfd   :  { %716 = dma.vmem_to_hbm [thread:$0]  %s1434_s17, 1024, %s1607_s3, [#allocation3], %s1075_s9, %s1075_s9, %s1076_s10   ;;  %v537_v0 = vmul.f32 0.6931472, %v900_v60  ;;  %v676_v11 = vadd.f32 1.0, %v543_v57  ;;  %v607_v13 = vmul.f32 %v526_v59, %v510_v58  ;;  %655 = vst.msk [vmem:[#allocation7 + $0x30] sm:$0xff] %vm592_vm4, %v646_v61  ;;  %v663_v8 = vmul.f32 %v646_v61, %v510_v58 }
  0xfe   :  { %909 = vpow2.f32 %v578_v38  ;;  %698 = vst.msk [vmem:[#allocation10 + $0x8] sm:$0xff] %vm592_vm4, %v690_v63  ;;  %v571_v21 = vmul.f32 0.5, %v814_v7  ;;  %s949_s3 = scalar_lea.vmem %s1446_s19, 1024  ;;  %p954_p9 = scmp.lt.s32.totalorder %s1446_s19, %s1446_s19 }
  0xff   :  { %v811_v3 = vclamps-f32 %v537_v0, 10.0  ;;  %v673_v17 = vadd.f32 1.0, %v537_v0  ;;  %p950_p8 = scmp.ne.s32.totalorder %s1446_s19, %s949_s3  ;;  %p955_p10 = scmp.lt.s32.totalorder %s949_s3, %s949_s3 }
 0x101   :  { %p956_p11 = por %p955_p10, %p954_p9 }
 0x103   :  { %p957_p12 = pnand %p956_p11, %p950_p8 }
 0x105   :  { %960 = shalt.err (!%p957_p12)
}
 0x106   :  { %s961_s15 = scalar_lea.hbm %s1610_s6, 1024 }
 0x107   :  { %p962_p13 = scmp.ne.s32.totalorder %s1610_s6, %s961_s15  ;;  %p965_p0 = scmp.lt.u32.totalorder %s961_s15, %s1610_s6 }
 0x109   :  { %p967_p1 = pnand %p965_p0, %p962_p13 }
 0x10b   :  { %970 = shalt.err (!%p967_p1)
}
 0x10c   :  { %752 = dma.vmem_to_hbm [thread:$0]  %s1446_s19, 1024, %s1610_s6, [#allocation8], %s1075_s9, %s1075_s9, %s1076_s10   ;;  %v684_v22 = vsub.f32 %v676_v11, %v1378_v56  ;;  %v547_v23 = vmul.f32 0.6931472, %v902_v14  ;;  %911 = vlog2.f32 %v1471_v5  ;;  %615 = vst.msk [vmem:[#allocation4 + $0x30] sm:$0xff] %vm592_vm4, %v607_v13  ;;  %671 = vst.msk [vmem:[#allocation9 + $0x30] sm:$0xff] %vm592_vm4, %v663_v8  ;;  %v904_v26 = vpop.eup %903  ;;  %v681_v48 = vsub.f32 %v673_v17, %v1383_v2 }
 0x10d   :  { %v568_v28 = vmul.f32 0.5, %v811_v3  ;;  %v582_v20 = vmul.f32 1.442695, %v571_v21  ;;  %s971_s24 = scalar_lea.vmem %s1475_s21, 1024  ;;  %p976_p3 = scmp.lt.s32.totalorder %s1475_s21, %s1475_s21 }
 0x10e   :  { %p972_p2 = scmp.ne.s32.totalorder %s1475_s21, %s971_s24  ;;  %p977_p4 = scmp.lt.s32.totalorder %s971_s24, %s971_s24 }
 0x110   :  { %p978_p5 = por %p977_p4, %p976_p3 }
 0x112   :  { %p979_p6 = pnand %p978_p5, %p972_p2 }
 0x114   :  { %982 = shalt.err (!%p979_p6)
}
 0x115   :  { %s983_s26 = scalar_lea.hbm %s1608_s4, 1024 }
 0x116   :  { %p984_p7 = scmp.ne.s32.totalorder %s1608_s4, %s983_s26  ;;  %p987_p8 = scmp.lt.u32.totalorder %s983_s26, %s1608_s4 }
 0x118   :  { %p989_p9 = pnand %p987_p8, %p984_p7 }
 0x11a   :  { %992 = shalt.err (!%p989_p9)
}
 0x11b   :  { %728 = dma.vmem_to_hbm [thread:$0]  %s1475_s21, 1024, %s1608_s4, [#allocation5], %s1075_s9, %s1075_s9, %s1076_s10   ;;  %v906_v56 = vpop.eup %905  ;;  %v692_v2 = vmul.f32 -0.5, %v684_v22  ;;  %v541_v29 = vmul.f32 0.6931472, %v904_v26  ;;  %v816_v12 = vclamps-f32 %v547_v23, 10.0  ;;  %913 = vpow2.f32 %v582_v20 }
 0x11c   :  { %v678_v31 = vadd.f32 1.0, %v547_v23  ;;  %v576_v32 = vmul.f32 1.442695, %v568_v28  ;;  %v689_v33 = vmul.f32 -0.5, %v681_v48  ;;  %v551_v34 = vmul.f32 0.6931472, %v906_v56  ;;  %v908_v37 = vpop.eup %907  ;;  %p998_p11 = scmp.lt.s32.totalorder %s1503_s25, %s1503_s25 }
 0x11d   :  { %700 = vst.msk [vmem:[#allocation10 + $0x18] sm:$0xff] %vm592_vm4, %v692_v2  ;;  %v813_v39 = vclamps-f32 %v541_v29, 10.0  ;;  %v675_v42 = vadd.f32 1.0, %v541_v29  ;;  %v573_v43 = vmul.f32 0.5, %v816_v12  ;;  %s993_s4 = scalar_lea.vmem %s1503_s25, 1024 }
 0x11e   :  { %v686_v44 = vsub.f32 %v678_v31, %v1404_v54  ;;  %p994_p10 = scmp.ne.s32.totalorder %s1503_s25, %s993_s4  ;;  %p999_p12 = scmp.lt.s32.totalorder %s993_s4, %s993_s4 }
 0x120   :  { %p1000_p13 = por %p999_p12, %p998_p11 }
 0x122   :  { %p1001_p0 = pnand %p1000_p13, %p994_p10 }
 0x124   :  { %1004 = shalt.err (!%p1001_p0)
}
 0x125   :  { %s1005_s11 = scalar_lea.hbm %s1611_s7, 1024 }
 0x126   :  { %p1006_p1 = scmp.ne.s32.totalorder %s1611_s7, %s1005_s11  ;;  %p1009_p2 = scmp.lt.u32.totalorder %s1005_s11, %s1611_s7 }
 0x128   :  { %p1011_p3 = pnand %p1009_p2, %p1006_p1 }
 0x12a   :  { %1014 = shalt.err (!%p1011_p3)
}
 0x12b   :  { %764 = dma.vmem_to_hbm [thread:$0]  %s1503_s25, 1024, %s1611_s7, [#allocation8], %s1075_s9, %s1075_s9, %s1076_s10   ;;  %915 = vpow2.f32 %v576_v32  ;;  %697 = vst.msk [vmem:[#allocation10] sm:$0xff] %vm592_vm4, %v689_v33  ;;  %v545_v54 = vmul.f32 0.6931472, %v908_v37  ;;  %v818_v25 = vclamps-f32 %v551_v34, 10.0  ;;  %v683_v10 = vsub.f32 %v675_v42, %v1411_v41  ;;  %v910_v51 = vpop.eup %909 }
 0x12c   :  { %v680_v45 = vadd.f32 1.0, %v551_v34  ;;  %v570_v6 = vmul.f32 0.5, %v813_v39  ;;  %v586_v27 = vmul.f32 1.442695, %v573_v43  ;;  %v694_v40 = vmul.f32 -0.5, %v686_v44  ;;  %v912_v58 = vpop.eup %911  ;;  %s1077_s7 = smov [#allocation10]  }
 0x12d   :  { %v815_v18 = vclamps-f32 %v545_v54, 10.0  ;;  %v677_v49 = vadd.f32 1.0, %v545_v54  ;;  %v575_v46 = vmul.f32 0.5, %v818_v25  ;;  %v691_v50 = vmul.f32 -0.5, %v683_v10  ;;  %v914_v61 = vpop.eup %913  ;;  %s770_s25 = sshll.u32 %s1077_s7, 4  ;;  %s771_s25 = int_to_ptr.vmem [resolvable:$true] %s770_s25 }
 0x12e   :  { %v688_v47 = vsub.f32 %v680_v45, %v1421_v36  ;;  %v580_v19 = vmul.f32 1.442695, %v570_v6  ;;  %917 = vpow2.f32 %v586_v27  ;;  %702 = vst.msk [vmem:[#allocation10 + $0x28] sm:$0xff] %vm592_vm4, %v694_v40  ;;  %v618_v41 = vmul.f32 %v910_v51, %v1299_v30  ;;  %s1015_s17 = scalar_lea.vmem %s771_s25, 1024  ;;  %p1020_p5 = scmp.lt.s32.totalorder %s771_s25, %s771_s25 }
 0x12f   :  { %v572_v52 = vmul.f32 0.5, %v815_v18  ;;  %v685_v53 = vsub.f32 %v677_v49, %v1428_v62  ;;  %v590_v55 = vmul.f32 1.442695, %v575_v46  ;;  %699 = vst.msk [vmem:[#allocation10 + $0x10] sm:$0xff] %vm592_vm4, %v691_v50  ;;  %v549_v36 = vmul.f32 0.6931472, %v912_v58  ;;  %p1016_p4 = scmp.ne.s32.totalorder %s771_s25, %s1015_s17  ;;  %p1021_p6 = scmp.lt.s32.totalorder %s1015_s17, %s1015_s17 }
 0x130   :  { %v696_v57 = vmul.f32 -0.5, %v688_v47  ;;  %919 = vpow2.f32 %v580_v19  ;;  %626 = vst.msk [vmem:[#allocation6 + $0x8] sm:$0xff] %vm592_vm4, %v618_v41  ;;  %v620_v63 = vmul.f32 %v914_v61, %v1305_v1 }
 0x131   :  { %v584_v59 = vmul.f32 1.442695, %v572_v52  ;;  %v693_v60 = vmul.f32 -0.5, %v685_v53  ;;  %921 = vpow2.f32 %v590_v55  ;;  %v817_v62 = vclamps-f32 %v549_v36, 10.0  ;;  %p1022_p7 = por %p1021_p6, %p1020_p5 }
 0x132   :  { %704 = vst.msk [vmem:[#allocation10 + $0x38] sm:$0xff] %vm592_vm4, %v696_v57  ;;  %v679_v38 = vadd.f32 1.0, %v549_v36  ;;  %628 = vst.msk [vmem:[#allocation6 + $0x18] sm:$0xff] %vm592_vm4, %v620_v63 }
 0x133   :  { %923 = vpow2.f32 %v584_v59  ;;  %701 = vst.msk [vmem:[#allocation10 + $0x20] sm:$0xff] %vm592_vm4, %v693_v60  ;;  %v574_v0 = vmul.f32 0.5, %v817_v62  ;;  %p1023_p8 = pnand %p1022_p7, %p1016_p4 }
 0x134   :  { %v687_v7 = vsub.f32 %v679_v38, %v1471_v5 }
 0x135   :  { %v916_v30 = vpop.eup %915  ;;  %v588_v13 = vmul.f32 1.442695, %v574_v0 }
 0x136   :  { %v617_v11 = vmul.f32 %v916_v30, %v1310_v4  ;;  %v695_v8 = vmul.f32 -0.5, %v687_v7 }
 0x137   :  { %925 = vpow2.f32 %v588_v13 }
 0x138   :  { %v918_v14 = vpop.eup %917  ;;  %625 = vst.msk [vmem:[#allocation6] sm:$0xff] %vm592_vm4, %v617_v11  ;;  %703 = vst.msk [vmem:[#allocation10 + $0x30] sm:$0xff] %vm592_vm4, %v695_v8 }
 0x139   :  { %v622_v3 = vmul.f32 %v918_v14, %v1321_v9 }
 0x13a   :  { %v920_v1 = vpop.eup %919 }
 0x13b   :  { %1026 = shalt.err (!%p1023_p8)
}
 0x13c   :  { %s1027_s22 = scalar_lea.hbm %s1612_s8, 1024 }
 0x13d   :  { %p1028_p9 = scmp.ne.s32.totalorder %s1612_s8, %s1027_s22  ;;  %p1031_p10 = scmp.lt.u32.totalorder %s1027_s22, %s1612_s8 }
 0x13f   :  { %p1033_p11 = pnand %p1031_p10, %p1028_p9 }
 0x141   :  { %1036 = shalt.err (!%p1033_p11)
}
 0x142   :  { %776 = dma.vmem_to_hbm [thread:$0]  %s771_s25, 1024, %s1612_s8, [#allocation11], %s1075_s9, %s1075_s9, %s1076_s10   ;;  %v922_v4 = vpop.eup %921  ;;  %v619_v9 = vmul.f32 %v920_v1, %v1328_v35  ;;  %630 = vst.msk [vmem:[#allocation6 + $0x28] sm:$0xff] %vm592_vm4, %v622_v3 }
 0x143   :  { %v624_v5 = vmul.f32 %v922_v4, %v1334_v16  ;;  %v924_v17 = vpop.eup %923  ;;  %s1078_s27 = smov [#allocation6]  }
 0x144   :  { %627 = vst.msk [vmem:[#allocation6 + $0x10] sm:$0xff] %vm592_vm4, %v619_v9  ;;  %v621_v21 = vmul.f32 %v924_v17, %v1339_v15  ;;  %s734_s2 = sshll.u32 %s1078_s27, 4  ;;  %v926_v22 = vpop.eup %925  ;;  %s735_s2 = int_to_ptr.vmem [resolvable:$true] %s734_s2 }
 0x145   :  { %632 = vst.msk [vmem:[#allocation6 + $0x38] sm:$0xff] %vm592_vm4, %v624_v5  ;;  %v623_v23 = vmul.f32 %v926_v22, %v1345_v24  ;;  %s1037_s8 = scalar_lea.vmem %s735_s2, 1024  ;;  %p1042_p13 = scmp.lt.s32.totalorder %s735_s2, %s735_s2 }
 0x146   :  { %629 = vst.msk [vmem:[#allocation6 + $0x20] sm:$0xff] %vm592_vm4, %v621_v21  ;;  %p1038_p12 = scmp.ne.s32.totalorder %s735_s2, %s1037_s8  ;;  %p1043_p0 = scmp.lt.s32.totalorder %s1037_s8, %s1037_s8 }
 0x147   :  { %631 = vst.msk [vmem:[#allocation6 + $0x30] sm:$0xff] %vm592_vm4, %v623_v23 }
 0x148   :  { %p1044_p1 = por %p1043_p0, %p1042_p13 }
 0x14a   :  { %p1045_p2 = pnand %p1044_p1, %p1038_p12 }
 0x14c   :  { %1048 = shalt.err (!%p1045_p2)
}
 0x14d   :  { %s1049_s29 = scalar_lea.hbm %s1609_s5, 1024 }
 0x14e   :  { %p1050_p3 = scmp.ne.s32.totalorder %s1609_s5, %s1049_s29  ;;  %p1053_p4 = scmp.lt.u32.totalorder %s1049_s29, %s1609_s5 }
 0x150   :  { %p1055_p5 = pnand %p1053_p4, %p1050_p3 }
 0x152   :  { %1058 = shalt.err (!%p1055_p5)
}
 0x153   :  { %740 = dma.vmem_to_hbm [thread:$0]  %s735_s2, 1024, %s1609_s5, [#allocation5], %s1075_s9, %s1075_s9, %s1076_s10  }
 0x154   :  { %1059 = dma.done.wait [#allocation3], 1024  }
 0x155   :  { %1060 = vsyncadd [#allocation3], 4294966272 }
 0x156   :  { %1061 = dma.done.wait [#allocation5], 2048  }
 0x157   :  { %1062 = vsyncadd [#allocation5], 4294965248 }
 0x158   :  { %1063 = dma.done.wait [#allocation8], 2048  }
 0x159   :  { %1064 = vsyncadd [#allocation8], 4294965248 }
 0x15a   :  { %1065 = dma.done.wait [#allocation11], 1024  }
 0x15b   :  { %1066 = vsyncadd [#allocation11], 4294966272 }
 0x15c   :  { %795 = vsyncpa [#allocation3], 1 }
 0x15d   :  { %796 = vsyncpa [#allocation5], 1 }
 0x15e   :  { %797 = vsyncpa [#allocation8], 1 }
 0x15f   :  { %798 = vsyncpa [#allocation11], 1 }

</bundles_post_ra>
